<compile_context>
chip_gen: v6e
topology: v6e:2x2x1
jax: 0.10.0
libtpu: 0.0.40
codegen_flags: <defaults>
</compile_context>

<pallas_src>
import jax
import jax.numpy as jnp
from jax.experimental import pallas as pl
from jax.experimental.pallas import tpu as pltpu

HIDDEN = 30
LANE = 128
SUBLANE = 8


def _round_up(n, m):
    return ((n + m - 1) // m) * m


def mlp_kernel(x_ref, w1_ref, b1_ref, w2_ref, b2_ref, out_ref):
    # First linear + ReLU (MXU matmul, f32 accumulation; ReLU/add on VPU).
    h = jnp.dot(x_ref[...], w1_ref[...], preferred_element_type=jnp.float32)
    h = jnp.maximum(h + b1_ref[...], 0.0)          # b1 is (1, 30), broadcasts
    # Second linear (output lane-padded to a multiple of 128 -> unmasked stores).
    q = jnp.dot(h, w2_ref[...], preferred_element_type=jnp.float32)
    out_ref[...] = (q + b2_ref[...]).astype(out_ref.dtype)


def network_forward(x, w1, b1, w2, b2, *, batch_tile=512):
    """x: [B, nb_inputs]; returns q_values: [B, nb_actions] (float32)."""
    B, nb_inputs = x.shape
    hidden, nb_actions = w2.shape

    # Lane-dense output: pad action axis to a multiple of 128; slice in wrapper.
    A_pad = _round_up(nb_actions, LANE)
    w2p = jnp.pad(w2, ((0, 0), (0, A_pad - nb_actions)))
    b2p = jnp.pad(b2, ((0, 0), (0, A_pad - nb_actions)))

    if B <= batch_tile:
        # Small problem: grid-free call, whole arrays resident in VMEM.
        B_pad = _round_up(max(B, 1), SUBLANE)
        xp = jnp.pad(x, ((0, B_pad - B), (0, 0)))
        out = pl.pallas_call(
            mlp_kernel,
            out_shape=jax.ShapeDtypeStruct((B_pad, A_pad), jnp.float32),
        )(xp, w1, b1, w2p, b2p)
    else:
        # Large batch: stream batch tiles, keep weights/biases VMEM-resident
        # across iterations, shard the batch axis across TensorCores.
        TB = batch_tile
        B_pad = _round_up(B, TB)
        xp = jnp.pad(x, ((0, B_pad - B), (0, 0)))
        out = pl.pallas_call(
            mlp_kernel,
            out_shape=jax.ShapeDtypeStruct((B_pad, A_pad), jnp.float32),
            grid_spec=pl.GridSpec(
                grid=(B_pad // TB,),
                in_specs=[
                    pl.BlockSpec((TB, nb_inputs), lambda i: (i, 0)),
                    pl.BlockSpec((nb_inputs, hidden), lambda i: (0, 0)),
                    pl.BlockSpec((1, hidden), lambda i: (0, 0)),
                    pl.BlockSpec((hidden, A_pad), lambda i: (0, 0)),
                    pl.BlockSpec((1, A_pad), lambda i: (0, 0)),
                ],
                out_specs=pl.BlockSpec((TB, A_pad), lambda i: (i, 0)),
            ),
            compiler_params=pltpu.CompilerParams(
                dimension_semantics=("parallel",),
            ),
        )(xp, w1, b1, w2p, b2p)

    return out[:B, :nb_actions]


def init_params(key, nb_inputs, nb_actions, hidden=HIDDEN):
    """Deterministic init mimicking nn.Linear's uniform(-1/sqrt(fan_in), +)."""
    k1, k2, k3, k4 = jax.random.split(key, 4)
    bound1 = 1.0 / jnp.sqrt(nb_inputs)
    bound2 = 1.0 / jnp.sqrt(hidden)
    w1 = jax.random.uniform(k1, (nb_inputs, hidden), jnp.float32, -bound1, bound1)
    b1 = jax.random.uniform(k2, (1, hidden), jnp.float32, -bound1, bound1)
    w2 = jax.random.uniform(k3, (hidden, nb_actions), jnp.float32, -bound2, bound2)
    b2 = jax.random.uniform(k4, (1, nb_actions), jnp.float32, -bound2, bound2)
    return w1, b1, w2, b2


def _reference(x, w1, b1, w2, b2):
    return jnp.maximum(x @ w1 + b1, 0.0) @ w2 + b2


if __name__ == "__main__":
    nb_inputs = 5      # state dimension
    nb_actions = 3     # number of Q-values / actions
    batch = 8

    key = jax.random.PRNGKey(0)
    k_x, k_p, k_big = jax.random.split(key, 3)
    x = jax.random.normal(k_x, (batch, nb_inputs), dtype=jnp.float32)
    w1, b1, w2, b2 = init_params(k_p, nb_inputs, nb_actions)

    # Small-batch (grid-free) path
    q_values = network_forward(x, w1, b1, w2, b2)
    jax.block_until_ready(q_values)
    ref = _reference(x, w1, b1, w2, b2)
    assert q_values.shape == (batch, nb_actions)
    assert jnp.allclose(q_values, ref, atol=1e-5), "small-batch mismatch vs reference"

    # Large-batch (tiled, parallel) path
    big_batch = 1024
    x_big = jax.random.normal(k_big, (big_batch, nb_inputs), dtype=jnp.float32)
    q_big = network_forward(x_big, w1, b1, w2, b2, batch_tile=512)
    jax.block_until_ready(q_big)
    ref_big = _reference(x_big, w1, b1, w2, b2)
    assert q_big.shape == (big_batch, nb_actions)
    assert jnp.allclose(q_big, ref_big, atol=1e-5), "large-batch mismatch vs reference"

    print("KERNEL_OK")
</pallas_src>

<mosaic_0001>
module attributes {stable_mosaic.version = 11 : i64} {
  func.func @mlp_kernel(%arg0: memref<8x5xf32, #tpu.memory_space<vmem>>, %arg1: memref<5x30xf32, #tpu.memory_space<vmem>>, %arg2: memref<1x30xf32, #tpu.memory_space<vmem>>, %arg3: memref<30x128xf32, #tpu.memory_space<vmem>>, %arg4: memref<1x128xf32, #tpu.memory_space<vmem>>, %arg5: memref<8x128xf32, #tpu.memory_space<vmem>>) attributes {dimension_semantics = [], scalar_prefetch = 0 : i64, scratch_operands = 0 : i64, tpu.core_type = #tpu.core_type<tc>} {
    %c0 = arith.constant 0 : index
    %c0_0 = arith.constant 0 : index
    %0 = vector.load %arg0[%c0, %c0_0] : memref<8x5xf32, #tpu.memory_space<vmem>>, vector<8x5xf32>
    %c0_1 = arith.constant 0 : index
    %c0_2 = arith.constant 0 : index
    %1 = vector.load %arg1[%c0_1, %c0_2] : memref<5x30xf32, #tpu.memory_space<vmem>>, vector<5x30xf32>
    %cst = arith.constant dense<0.000000e+00> : vector<8x30xf32>
    %2 = tpu.matmul %0, %1, %cst {dimension_numbers = #tpu.dot_dimension_numbers<[1], [0], [0], [1], [0, 0, 1, 1], [], []>} : vector<8x5xf32>, vector<5x30xf32>, vector<8x30xf32> -> vector<8x30xf32>
    %c0_3 = arith.constant 0 : index
    %c0_4 = arith.constant 0 : index
    %3 = vector.load %arg2[%c0_3, %c0_4] : memref<1x30xf32, #tpu.memory_space<vmem>>, vector<1x30xf32>
    %4 = vector.broadcast %3 : vector<1x30xf32> to vector<8x30xf32>
    %5 = arith.addf %2, %4 : vector<8x30xf32>
    %cst_5 = arith.constant 0.000000e+00 : f32
    %6 = vector.broadcast %cst_5 : f32 to vector<8x30xf32>
    %7 = arith.maximumf %5, %6 : vector<8x30xf32>
    %c0_6 = arith.constant 0 : index
    %c0_7 = arith.constant 0 : index
    %8 = vector.load %arg3[%c0_6, %c0_7] : memref<30x128xf32, #tpu.memory_space<vmem>>, vector<30x128xf32>
    %cst_8 = arith.constant dense<0.000000e+00> : vector<8x128xf32>
    %9 = tpu.matmul %7, %8, %cst_8 {dimension_numbers = #tpu.dot_dimension_numbers<[1], [0], [0], [1], [0, 0, 1, 1], [], []>} : vector<8x30xf32>, vector<30x128xf32>, vector<8x128xf32> -> vector<8x128xf32>
    %c0_9 = arith.constant 0 : index
    %c0_10 = arith.constant 0 : index
    %10 = vector.load %arg4[%c0_9, %c0_10] : memref<1x128xf32, #tpu.memory_space<vmem>>, vector<1x128xf32>
    %11 = vector.broadcast %10 : vector<1x128xf32> to vector<8x128xf32>
    %12 = arith.addf %9, %11 : vector<8x128xf32>
    %c0_11 = arith.constant 0 : index
    %c0_12 = arith.constant 0 : index
    %13 = vector.load %arg5[%c0_11, %c0_12] : memref<8x128xf32, #tpu.memory_space<vmem>>, vector<8x128xf32>
    tpu.vector_store %arg5[%c0_11, %c0_12], %12 {strides = array<i32>} : memref<8x128xf32, #tpu.memory_space<vmem>>, vector<8x128xf32>,
    return
  }
}

</mosaic_0001>

<bundles_post_ra>
// kernel: tpu_custom_call.1
= control target key start
LH: loop header
LB: loop body
LE: loop exit
PB: predicated region body
PF: predicated region fallthrough
CT: control target
= control target key end

     0   :  { %10 = vsyncpa [#allocation3], 0  ;;  %s431_s0 = inlined_call_operand.hbm [shape: f32[8,5], index: 0, kind: input, shape index: {}]   ;;  %s432_s1 = inlined_call_operand.hbm [shape: f32[5,30], index: 1, kind: input, shape index: {}]   ;;  %s433_s2 = inlined_call_operand.vmem [shape: f32[1,30], index: 2, kind: input, shape index: {}]   ;;  %s434_s3 = inlined_call_operand.hbm [shape: f32[30,128], index: 3, kind: input, shape index: {}]   ;;  %s435_s4 = inlined_call_operand.vmem [shape: f32[1,128], index: 4, kind: input, shape index: {}]   ;;  %s436_s5 = inlined_call_operand.hbm [shape: f32[8,128], index: 5, kind: output, shape index: {}]  }
   0x1   :  { %11 = vsyncpa [#allocation6], 0 }
   0x2   :  { %12 = vsyncpa [#allocation4], 0  ;;  %s375_s18 = smov [#allocation5]   ;;  %s376_s20 = smov [#allocation2]  }
   0x3   :  { %s29_s19 = sshll.u32 %s375_s18, 4  ;;  %s19_s21 = sshll.u32 %s376_s20, 4  ;;  %s30_s19 = int_to_ptr.vmem [resolvable:$true] %s29_s19  ;;  %s20_s21 = int_to_ptr.vmem [resolvable:$true] %s19_s21 }
   0x4   :  { %s297_s22 = scalar_lea.vmem %s30_s19, 128  ;;  %p302_p1 = scmp.lt.s32.totalorder %s30_s19, %s30_s19 }
   0x5   :  { %p298_p0 = scmp.ne.s32.totalorder %s30_s19, %s297_s22  ;;  %p303_p2 = scmp.lt.s32.totalorder %s297_s22, %s297_s22 }
   0x7   :  { %p304_p3 = por %p303_p2, %p302_p1 }
   0x9   :  { %p305_p4 = pnand %p304_p3, %p298_p0 }
   0xb   :  { %308 = shalt.err (!%p305_p4)
}
   0xc   :  { %32 = dma.hbm_to_vmem [thread:$0]  %s432_s1, 128, %s30_s19, [#allocation6]  }
   0xd   :  { %s317_s25 = scalar_lea.vmem %s20_s21, 128  ;;  %p322_p6 = scmp.lt.s32.totalorder %s20_s21, %s20_s21 }
   0xe   :  { %p318_p5 = scmp.ne.s32.totalorder %s20_s21, %s317_s25  ;;  %p323_p7 = scmp.lt.s32.totalorder %s317_s25, %s317_s25 }
  0x10   :  { %p324_p8 = por %p323_p7, %p322_p6 }
  0x12   :  { %p325_p9 = pnand %p324_p8, %p318_p5 }
  0x14   :  { %328 = shalt.err (!%p325_p9)
}
  0x15   :  { %22 = dma.hbm_to_vmem [thread:$0]  %s431_s0, 128, %s20_s21, [#allocation3]  }
  0x16   :  { %s377_s28 = smov [#allocation7]  }
  0x17   :  { %s40_s29 = sshll.u32 %s377_s28, 4  ;;  %s41_s29 = int_to_ptr.vmem [resolvable:$true] %s40_s29 }
  0x18   :  { %s337_s30 = scalar_lea.vmem %s41_s29, 512  ;;  %p342_p11 = scmp.lt.s32.totalorder %s41_s29, %s41_s29 }
  0x19   :  { %p338_p10 = scmp.ne.s32.totalorder %s41_s29, %s337_s30  ;;  %p343_p12 = scmp.lt.s32.totalorder %s337_s30, %s337_s30 }
  0x1b   :  { %p344_p13 = por %p343_p12, %p342_p11 }
  0x1d   :  { %p345_p0 = pnand %p344_p13, %p338_p10 }
  0x1f   :  { %348 = shalt.err (!%p345_p0)
}
  0x20   :  { %s378_s1 = smov 128   ;;  %s379_s6 = smov 8  }
  0x21   :  { %46 = dma.hbm_to_vmem [thread:$0]  %s434_s3, 512, %s41_s29, [#allocation6], %s378_s1, %s378_s1, %s379_s6  }
  0x22   :  { %369 = dma.done.wait [#allocation3], 128  }
  0x23   :  { %370 = vsyncadd [#allocation3], 4294967168 }
  0x24   :  { %371 = dma.done.wait [#allocation6], 640  }
  0x25   :  { %372 = vsyncadd [#allocation6], 4294966656  ;;  %v380_v0 = vmov 0.0   ;;  %vm381_vm0 = vmmov 0   ;;  %vm71_vm1 = vcmask 1044480   ;;  %vm161_vm2 = vcmask 1045504  }
  0x26   :  { %265 = vmatprep.subr.mxu0 %v380_v0  ;;  %267 = vmatprep.mubr.msk.f32.mxu0 %vm381_vm0, %v380_v0  ;;  %vm67_vm3 = vcmask 39936   ;;  %v59_v1 = vld [vmem:[#allocation5] sm:$0x1f]  ;;  %v58_v2 = vld [vmem:[#allocation2] sm:$0xff]  ;;  %v147_v5 = vld [vmem:[#allocation7 + $0x8] sm:$0xff]  ;;  %vm157_vm4 = vcmask 244736  }
  0x27   :  { %270 = vmatprep.subr.mxu1 %v380_v0  ;;  %278 = vmatprep.mubr.msk.f32.mxu1 %vm381_vm0, %v380_v0  ;;  %v149_v3 = vld [vmem:[#allocation7 + $0x18] sm:$0x3f]  ;;  %v148_v4 = vld [vmem:[#allocation7 + $0x10] sm:$0xff]  ;;  %v146_v6 = vld [vmem:[#allocation7] sm:$0xff]  ;;  %s382_s11 = smov [#allocation8]  }
  0x28   :  { %266 = vmatpush3.msk.msra.mxu0 %vm71_vm1, %v59_v1  ;;  %271 = vmatpush3.msk.msra.mxu1 %vm161_vm2, %v149_v3  ;;  %v252_v7 = vld [vmem:[%s433_s2] ss:$0 sm:$0xff]  ;;  %s242_s12 = sshll.u32 %s382_s11, 4  ;;  %s243_s12 = int_to_ptr.vmem [resolvable:$true] %s242_s12 }
  0x29   :  { %268 = vmatmul.mubr.msk.f32.vlgmr.msra.gmra.mxu0 %vm67_vm3, %v58_v2  ;;  %272 = vmatprep.subr.mxu1 %v380_v0  ;;  %v255_v12 = vld [vmem:[%s435_s4] ss:$0 sm:$0xff]  ;;  %s349_s13 = scalar_lea.vmem %s243_s12, 128  ;;  %p354_p2 = scmp.lt.s32.totalorder %s243_s12, %s243_s12 }
  0x2a   :  { %273 = vmatpush3.msra.mxu1 %v148_v4  ;;  %p350_p1 = scmp.ne.s32.totalorder %s243_s12, %s349_s13  ;;  %p355_p3 = scmp.lt.s32.totalorder %s349_s13, %s349_s13 }
  0x2b   :  { %274 = vmatprep.subr.mxu1 %v380_v0 }
  0x2c   :  { %275 = vmatpush3.msra.mxu1 %v147_v5  ;;  %p356_p4 = por %p355_p3, %p354_p2 }
  0x2d   :  { %276 = vmatprep.subr.mxu1 %v380_v0 }
  0x2e   :  { %277 = vmatpush3.msra.mxu1 %v146_v6  ;;  %p357_p5 = pnand %p356_p4, %p350_p1 }
  0xe9   :  { %v141_v8 = vpop.f32.mrf.mxu0 }
  0xea   :  { %v142_v9 = vadd.f32 %v252_v7, %v141_v8 }
  0xeb   :  { %v269_v10 = vpop.f32.mrf.mxu0 }
  0xec   :  { %v145_v11 = vmax.f32 %v142_v9, 0.0 }
  0xee   :  { %279 = vmatmul.mubr.msk.f32.vlgmr.msra.gmra.mxu1 %vm157_vm4, %v145_v11 }
 0x1ae   :  { %v231_v13 = vpop.f32.mrf.mxu1 }
 0x1af   :  { %v232_v14 = vadd.f32 %v255_v12, %v231_v13 }
 0x1b0   :  { %v280_v15 = vpop.f32.mrf.mxu1 }
 0x1b1   :  { %235 = vst [vmem:[#allocation8] sm:$0xff] %v232_v14 }
 0x1b2   :  { %360 = shalt.err (!%p357_p5)
}
 0x1b3   :  { %245 = dma.vmem_to_hbm [thread:$0]  %s243_s12, 128, %s436_s5, [#allocation4]  }
 0x1b4   :  { %373 = dma.done.wait [#allocation4], 128  }
 0x1b5   :  { %374 = vsyncadd [#allocation4], 4294967168 }
 0x1b6   :  { %249 = vsyncpa [#allocation3], 1 }
 0x1b7   :  { %250 = vsyncpa [#allocation6], 1 }
 0x1b8   :  { %251 = vsyncpa [#allocation4], 1 }

</bundles_post_ra>
